<compile_context>
chip_gen: v7x
topology: tpu7x:2x2x1
jax: 0.10.0
libtpu: 0.0.40
codegen_flags: <defaults>
</compile_context>

<pallas_src>
import functools

import jax
import jax.numpy as jnp
import numpy as np
from jax.experimental import pallas as pl
from jax.experimental.pallas import tpu as pltpu

# ----------------------------- config (small, synthetic) -----------------------------
HIDDEN = 128
N_HEADS = 4
N_KV_HEADS = 2                 # GQA (num_attention_heads != num_key_value_heads)
HEAD_SIZE = HIDDEN // N_HEADS  # 32
INTERMEDIATE = 256
VOCAB = 256
N_LAYERS = 2
RMS_EPS = 1e-6
ROPE_THETA = 10000.0
DTYPE = jnp.bfloat16           # bf16 storage, f32 accumulation inside kernels

QKV_WIDTH = (N_HEADS + 2 * N_KV_HEADS) * HEAD_SIZE   # 256
Q_WIDTH = N_HEADS * HEAD_SIZE                        # 128
KV_WIDTH = 2 * N_KV_HEADS * HEAD_SIZE                # 128


def _default_vmem_limit():
    """Generation-aware VMEM budget: ~48 MiB on v7x (64 MiB physical), larger on
    v5e/v6e (128 MiB). Falls back to a safe 32 MiB if the query is unavailable."""
    try:
        cap = getattr(pltpu.get_tpu_info(), "vmem_capacity_bytes", None)
        if cap:
            return int(min(cap * 3 // 4, 96 * 1024 * 1024))
    except Exception:
        pass
    return 32 * 1024 * 1024


VMEM_LIMIT = _default_vmem_limit()


def _pick_tile(dim, target):
    """Largest tile <= target that divides dim (falls back to the full dim)."""
    t = min(dim, target)
    while t > 1 and dim % t:
        t //= 2
    return t if dim % t == 0 else dim


def _pick_parallel_tile(dim, target, min_tile=8):
    """Like _pick_tile but, when the dim allows it, caps the tile at dim//2 so a
    'parallel' grid axis gets >= 2 steps and v7x's second TensorCore stays busy."""
    if dim >= 2 * min_tile:
        target = min(target, dim // 2)
    return _pick_tile(dim, max(target, 1))


# ----------------------------- generic tiled matmul (lm_head) -----------------------------
def _matmul_kernel(x_ref, w_ref, o_ref, acc_ref):
    @pl.when(pl.program_id(2) == 0)
    def _init():
        acc_ref[...] = jnp.zeros(acc_ref.shape, jnp.float32)

    acc_ref[...] += jnp.dot(x_ref[...], w_ref[...], preferred_element_type=jnp.float32)

    @pl.when(pl.program_id(2) == pl.num_programs(2) - 1)
    def _fin():
        o_ref[...] = acc_ref[...].astype(o_ref.dtype)


def linear(x, w, *, tm=256, tn=256, tk=512):
    M, K = x.shape
    Kw, N = w.shape
    assert K == Kw
    tm = _pick_parallel_tile(M, tm)
    tn = _pick_parallel_tile(N, tn, min_tile=128)
    tk = _pick_tile(K, tk)
    return pl.pallas_call(
        _matmul_kernel,
        out_shape=jax.ShapeDtypeStruct((M, N), x.dtype),
        grid=(M // tm, N // tn, K // tk),
        in_specs=[
            pl.BlockSpec((tm, tk), lambda i, j, k: (i, k)),
            pl.BlockSpec((tk, tn), lambda i, j, k: (k, j)),
        ],
        out_specs=pl.BlockSpec((tm, tn), lambda i, j, k: (i, j)),
        scratch_shapes=[pltpu.VMEM((tm, tn), jnp.float32)],
        compiler_params=pltpu.CompilerParams(
            dimension_semantics=("parallel", "parallel", "arbitrary"),
            vmem_limit_bytes=VMEM_LIMIT,
        ),
    )(x, w)


# ----------------------------- fused residual + RMSNorm + QKV GEMM + RoPE -----------------------------
def _qkv_rope_kernel(*refs, eps, has_residual, q_cols):
    if has_residual:
        (x_ref, r_ref, ln_ref, w_ref, rot_ref, cos_ref, sin_ref,
         q_ref, kv_ref, res_ref) = refs
        x = x_ref[...].astype(jnp.float32) + r_ref[...].astype(jnp.float32)
    else:
        (x_ref, ln_ref, w_ref, rot_ref, cos_ref, sin_ref,
         q_ref, kv_ref, res_ref) = refs
        x = x_ref[...].astype(jnp.float32)
    res_ref[...] = x.astype(res_ref.dtype)

    # RMSNorm (f32 stats) fused into the GEMM prologue (K = HIDDEN fits one tile).
    var = jnp.mean(x * x, axis=-1, keepdims=True)
    normed = (x * jax.lax.rsqrt(var + eps)
              * ln_ref[...].astype(jnp.float32)).astype(DTYPE)

    # QKV projection: bf16 MXU inputs, f32 accumulator, full row resident.
    acc = jnp.dot(normed, w_ref[...], preferred_element_type=jnp.float32)  # (tm, 256)

    # Lane-dense rotate-half RoPE: rot_ref is a constant +-1/0 matrix so (acc @ rot)
    # equals per-head [-x2, x1] on the rotated (q + k) columns and 0 on the V columns;
    # cos/sin are pre-replicated (tm, 256) slabs (cos=1 / sin=0 over V).
    rot = jnp.dot(acc, rot_ref[...], preferred_element_type=jnp.float32)
    out = acc * cos_ref[...] + rot * sin_ref[...]

    q_ref[...] = out[:, :q_cols].astype(q_ref.dtype)
    kv_ref[...] = out[:, q_cols:].astype(kv_ref.dtype)   # torch [T, 2, n_kv, D] flat


def qkv_rope(x, residual, ln_w, w_qkv, rot_mat, cos_full, sin_full, *,
             q_cols, eps=RMS_EPS, tm=256):
    T, H = x.shape
    qkv_w = w_qkv.shape[1]
    assert w_qkv.shape[0] == H and rot_mat.shape == (qkv_w, qkv_w)
    tm = _pick_parallel_tile(T, tm)
    has_residual = residual is not None
    kernel = functools.partial(_qkv_rope_kernel, eps=eps,
                               has_residual=has_residual, q_cols=q_cols)
    row_spec = pl.BlockSpec((tm, H), lambda i: (i, 0))
    in_specs = [row_spec]
    operands = [x]
    if has_residual:
        in_specs.append(row_spec)
        operands.append(residual)
    in_specs += [
        pl.BlockSpec((1, H), lambda i: (0, 0)),
        pl.BlockSpec((H, qkv_w), lambda i: (0, 0)),
        pl.BlockSpec((qkv_w, qkv_w), lambda i: (0, 0)),
        pl.BlockSpec((tm, qkv_w), lambda i: (i, 0)),
        pl.BlockSpec((tm, qkv_w), lambda i: (i, 0)),
    ]
    operands += [ln_w.reshape(1, H), w_qkv, rot_mat, cos_full, sin_full]
    return pl.pallas_call(
        kernel,
        out_shape=(jax.ShapeDtypeStruct((T, q_cols), x.dtype),
                   jax.ShapeDtypeStruct((T, qkv_w - q_cols), x.dtype),
                   jax.ShapeDtypeStruct((T, H), x.dtype)),
        grid=(T // tm,),
        in_specs=in_specs,
        out_specs=(pl.BlockSpec((tm, q_cols), lambda i: (i, 0)),
                   pl.BlockSpec((tm, qkv_w - q_cols), lambda i: (i, 0)),
                   row_spec),
        compiler_params=pltpu.CompilerParams(
            dimension_semantics=("parallel",), vmem_limit_bytes=VMEM_LIMIT),
    )(*operands)


# ----------------------------- fused residual + RMSNorm + MLP (gate/up + SwiGLU + down) -----------------------------
def _mlp_kernel(x_ref, r_ref, ln_ref, wgu_ref, wd_ref, o_ref, res_ref, *, eps, inter):
    x = x_ref[...].astype(jnp.float32) + r_ref[...].astype(jnp.float32)
    res_ref[...] = x.astype(res_ref.dtype)
    var = jnp.mean(x * x, axis=-1, keepdims=True)
    normed = (x * jax.lax.rsqrt(var + eps)
              * ln_ref[...].astype(jnp.float32)).astype(DTYPE)
    gu = jnp.dot(normed, wgu_ref[...], preferred_element_type=jnp.float32)  # (tm, 2I)
    g = gu[:, :inter]
    u = gu[:, inter:]
    h = (g * jax.nn.sigmoid(g) * u).astype(DTYPE)                           # SwiGLU
    o_ref[...] = jnp.dot(h, wd_ref[...],
                         preferred_element_type=jnp.float32).astype(o_ref.dtype)


def mlp_block(x, residual, ln_w, w_gate_up, w_down, *, eps=RMS_EPS, tm=256):
    T, H = x.shape
    inter, Hd = w_down.shape
    assert w_gate_up.shape == (H, 2 * inter) and Hd == H
    tm = _pick_parallel_tile(T, tm)
    kernel = functools.partial(_mlp_kernel, eps=eps, inter=inter)
    row_spec = pl.BlockSpec((tm, H), lambda i: (i, 0))
    return pl.pallas_call(
        kernel,
        out_shape=(jax.ShapeDtypeStruct((T, H), x.dtype),
                   jax.ShapeDtypeStruct((T, H), x.dtype)),
        grid=(T // tm,),
        in_specs=[row_spec, row_spec,
                  pl.BlockSpec((1, H), lambda i: (0, 0)),
                  pl.BlockSpec((H, 2 * inter), lambda i: (0, 0)),
                  pl.BlockSpec((inter, H), lambda i: (0, 0))],
        out_specs=(row_spec, row_spec),
        compiler_params=pltpu.CompilerParams(
            dimension_semantics=("parallel",), vmem_limit_bytes=VMEM_LIMIT),
    )(x, residual, ln_w.reshape(1, H), w_gate_up, w_down)


# ----------------------------- final RMSNorm (with residual add) -----------------------------
def _final_norm_kernel(x_ref, r_ref, w_ref, o_ref, *, eps):
    x = x_ref[...].astype(jnp.float32) + r_ref[...].astype(jnp.float32)
    var = jnp.mean(x * x, axis=-1, keepdims=True)
    o_ref[...] = (x * jax.lax.rsqrt(var + eps)
                  * w_ref[...].astype(jnp.float32)).astype(o_ref.dtype)


def final_rmsnorm(x, residual, weight, *, eps=RMS_EPS, tm=256):
    T, H = x.shape
    tm = _pick_parallel_tile(T, tm)
    kernel = functools.partial(_final_norm_kernel, eps=eps)
    row_spec = pl.BlockSpec((tm, H), lambda i: (i, 0))
    return pl.pallas_call(
        kernel,
        out_shape=jax.ShapeDtypeStruct((T, H), x.dtype),
        grid=(T // tm,),
        in_specs=[row_spec, row_spec, pl.BlockSpec((1, H), lambda i: (0, 0))],
        out_specs=row_spec,
        compiler_params=pltpu.CompilerParams(
            dimension_semantics=("parallel",), vmem_limit_bytes=VMEM_LIMIT),
    )(x, residual, weight.reshape(1, H))


# ----------------------------- flash varlen causal attention (+ fused o_proj) -----------------------------
def _flash_attn_kernel(seg_ids_ref, segr_ref, segc_ref, q_ref, kv_ref, wo_ref, o_ref,
                       q2_sc, m_sc, l_sc, acc_sc, *,
                       scale, n_kv, group, head_d, tq, tkv):
    qi = pl.program_id(0)
    ki = pl.program_id(1)
    q_start = qi * tq
    kv_start = ki * tkv

    @pl.when(ki == 0)
    def _init():
        m_sc[...] = jnp.full(m_sc.shape, -jnp.inf, dtype=jnp.float32)
        l_sc[...] = jnp.zeros(l_sc.shape, jnp.float32)
        acc_sc[...] = jnp.zeros(acc_sc.shape, jnp.float32)
        # GQA relayout of q (kv-invariant): once per q tile, reused for all kv tiles.
        qv = q_ref[...]
        for kh in range(n_kv):
            q2_sc[kh] = jnp.concatenate(
                [qv[:, (kh * group + g) * head_d:(kh * group + g + 1) * head_d]
                 for g in range(group)], axis=0)

    # Skip kv tiles fully above the causal diagonal, or whose segments all precede
    # every segment present in this q tile (packed-prefill segment skipping).
    causal_ok = kv_start <= q_start + tq - 1
    seg_ok = seg_ids_ref[kv_start + tkv - 1] >= seg_ids_ref[q_start]

    @pl.when(jnp.logical_and(causal_ok, seg_ok))
    def _compute():
        kv = kv_ref[...]                                               # (tkv, 2*nKV*D)
        row = jax.lax.broadcasted_iota(jnp.int32, (tq, tkv), 0) + q_start
        col = jax.lax.broadcasted_iota(jnp.int32, (tq, tkv), 1) + kv_start
        base_mask = (segr_ref[...] == segc_ref[...]) & (row >= col)    # (tq, tkv)
        neg = jnp.float32(-1e30)

        for kh in range(n_kv):
            k = kv[:, kh * head_d:(kh + 1) * head_d]                   # (tkv, D)
            v = kv[:, (n_kv + kh) * head_d:(n_kv + kh + 1) * head_d]   # (tkv, D)
            q2 = q2_sc[kh]                                             # (group*tq, D)
            s = jax.lax.dot_general(
                q2, k, (((1,), (1,)), ((), ())),
                preferred_element_type=jnp.float32) * scale            # (group*tq, tkv)
            # Mask without a group-way sublane concat: the reshape is a pure
            # leading-dim split, then the (tq, tkv) mask broadcasts over groups.
            s = jnp.where(base_mask[None], s.reshape(group, tq, tkv), neg)
            s = s.reshape(group * tq, tkv)
            m_prev = m_sc[kh]
            m_new = jnp.maximum(m_prev, jnp.max(s, axis=-1, keepdims=True))
            alpha = jnp.exp(m_prev - m_new)
            p = jnp.exp(s - m_new)
            l_sc[kh] = alpha * l_sc[kh] + jnp.sum(p, axis=-1, keepdims=True)
            acc_sc[kh] = alpha * acc_sc[kh] + jnp.dot(
                p.astype(kv.dtype), v, preferred_element_type=jnp.float32)
            m_sc[kh] = m_new

    @pl.when(ki == pl.num_programs(1) - 1)
    def _finalize():
        outs = []
        for kh in range(n_kv):
            out_h = acc_sc[kh] * pl.reciprocal(l_sc[kh], approx=True)  # (group*tq, D)
            for g in range(group):
                outs.append(out_h[g * tq:(g + 1) * tq])                # (tq, D)
        attn = jnp.concatenate(outs, axis=-1).astype(wo_ref.dtype)     # (tq, nH*D)
        # o_proj fused into the finalize (weights VMEM-resident, constant index map).
        o_ref[...] = jnp.dot(attn, wo_ref[...],
                             preferred_element_type=jnp.float32).astype(o_ref.dtype)


def flash_attention(q_flat, kv_flat, w_o, seg_ids, seg_row, seg_col, scale, *,
                    n_heads, n_kv, head_d, tq=512, tkv=512):
    T = q_flat.shape[0]
    H = w_o.shape[1]
    group = n_heads // n_kv
    tq = _pick_parallel_tile(T, tq)
    tkv = _pick_tile(T, tkv)
    kernel = functools.partial(_flash_attn_kernel, scale=scale, n_kv=n_kv,
                               group=group, head_d=head_d, tq=tq, tkv=tkv)
    grid_spec = pltpu.PrefetchScalarGridSpec(
        num_scalar_prefetch=1,                     # seg_ids -> SMEM (tile skipping)
        grid=(T // tq, T // tkv),
        in_specs=[
            pl.BlockSpec((tq, 1), lambda qi, ki, s: (qi, 0)),           # seg ids (rows)
            pl.BlockSpec((1, tkv), lambda qi, ki, s: (0, ki)),          # seg ids (cols)
            pl.BlockSpec((tq, n_heads * head_d), lambda qi, ki, s: (qi, 0)),
            pl.BlockSpec((tkv, 2 * n_kv * head_d), lambda qi, ki, s: (ki, 0)),
            pl.BlockSpec((n_heads * head_d, H), lambda qi, ki, s: (0, 0)),
        ],
        out_specs=pl.BlockSpec((tq, H), lambda qi, ki, s: (qi, 0)),
        scratch_shapes=[
            pltpu.VMEM((n_kv, group * tq, head_d), q_flat.dtype),       # grouped q
            pltpu.VMEM((n_kv, group * tq, 1), jnp.float32),             # m
            pltpu.VMEM((n_kv, group * tq, 1), jnp.float32),             # l
            pltpu.VMEM((n_kv, group * tq, head_d), jnp.float32),        # acc
        ],
    )
    return pl.pallas_call(
        kernel,
        out_shape=jax.ShapeDtypeStruct((T, H), q_flat.dtype),
        grid_spec=grid_spec,
        compiler_params=pltpu.CompilerParams(
            dimension_semantics=("parallel", "arbitrary"),
            vmem_limit_bytes=VMEM_LIMIT,
        ),
    )(seg_ids, seg_row, seg_col, q_flat, kv_flat, w_o)


# ----------------------------- glue (params, rope tables, model) -----------------------------
def init_params(key):
    keys = jax.random.split(key, 3 + N_LAYERS)

    def w(k, shape, scale=0.02):
        return (scale * jax.random.normal(k, shape, dtype=jnp.float32)).astype(DTYPE)

    params = {
        "embed": w(keys[0], (VOCAB, HIDDEN)),
        "norm_w": (1.0 + 0.01 * jax.random.normal(keys[1], (HIDDEN,))).astype(DTYPE),
        "lm_head": w(keys[2], (HIDDEN, VOCAB)),
        "layers": [],
    }
    for i in range(N_LAYERS):
        lk = jax.random.split(keys[3 + i], 6)
        params["layers"].append(dict(
            input_ln=(1.0 + 0.01 * jax.random.normal(lk[0], (HIDDEN,))).astype(DTYPE),
            post_ln=(1.0 + 0.01 * jax.random.normal(lk[1], (HIDDEN,))).astype(DTYPE),
            w_qkv=w(lk[2], (HIDDEN, QKV_WIDTH)),
            w_o=w(lk[3], (N_HEADS * HEAD_SIZE, HIDDEN)),
            # gate and up packed along the output dim (torch gate_up_proj layout).
            w_gate_up=w(lk[4], (HIDDEN, 2 * INTERMEDIATE)),
            w_down=w(lk[5], (INTERMEDIATE, HIDDEN)),
        ))
    return params


def rope_tables(position_ids, *, head_d, theta, n_heads, n_kv):
    """Lane-dense cos/sin slabs covering the whole QKV width: per rotated head
    (q + k) the pattern is [cos, cos] / [sin, sin]; V columns get cos=1 / sin=0."""
    T = position_ids.shape[0]
    d2 = head_d // 2
    inv_freq = 1.0 / (theta ** (jnp.arange(d2, dtype=jnp.float32) * 2.0 / head_d))
    freqs = position_ids.astype(jnp.float32)[:, None] * inv_freq[None, :]   # (T, d2)
    cos_h = jnp.tile(jnp.cos(freqs), (1, 2))                                # (T, D)
    sin_h = jnp.tile(jnp.sin(freqs), (1, 2))
    n_rot = n_heads + n_kv
    cos_full = jnp.concatenate(
        [jnp.tile(cos_h, (1, n_rot)), jnp.ones((T, n_kv * head_d), jnp.float32)], axis=-1)
    sin_full = jnp.concatenate(
        [jnp.tile(sin_h, (1, n_rot)), jnp.zeros((T, n_kv * head_d), jnp.float32)], axis=-1)
    return cos_full, sin_full


def rope_rotation_matrix(qkv_width, head_d, n_rot_heads):
    """Constant matrix R with (x @ R) == per-head rotate_half(x) = [-x2, x1] on the
    rotated (q + k) columns and 0 on the V columns (HF non-interleaved convention)."""
    d2 = head_d // 2
    R = np.zeros((qkv_width, qkv_width), np.float32)
    for h in range(n_rot_heads):
        b = h * head_d
        for i in range(d2):
            R[b + d2 + i, b + i] = -1.0    # out[:, b+i]    = -x[:, b+d2+i]
            R[b + i, b + d2 + i] = 1.0     # out[:, b+d2+i] =  x[:, b+i]
    return jnp.asarray(R)


def flash_llama_forward(params, input_ids, position_ids, cu_seqlens, cu_seqlens_q,
                        max_s, lm_head_indices=None):
    # TODO(synk): only the prefill path (past_key_values=None) is implemented; the
    # paged decode path (layer_past_present_indices / cu_seqlens_q) is not reproduced.
    del cu_seqlens_q, max_s
    T = input_ids.shape[0]
    assert T % 8 == 0  # TODO(synk): pad ragged packed token counts to a sublane multiple
    hidden = jnp.take(params["embed"], input_ids, axis=0)              # [T, H]

    seg_ids = jnp.searchsorted(
        cu_seqlens[1:], jnp.arange(T, dtype=cu_seqlens.dtype), side="right"
    ).astype(jnp.int32)
    seg_row = seg_ids.reshape(T, 1)
    seg_col = seg_ids.reshape(1, T)

    cos_full, sin_full = rope_tables(position_ids, head_d=HEAD_SIZE, theta=ROPE_THETA,
                                     n_heads=N_HEADS, n_kv=N_KV_HEADS)
    rot_mat = rope_rotation_matrix(QKV_WIDTH, HEAD_SIZE, N_HEADS + N_KV_HEADS)
    scale = HEAD_SIZE ** (-0.5)

    residual = None
    present = []
    for lp in params["layers"]:
        # fused: (residual add +) input RMSNorm + QKV GEMM + RoPE.
        q_flat, kv_flat, residual = qkv_rope(
            hidden, residual, lp["input_ln"], lp["w_qkv"], rot_mat, cos_full, sin_full,
            q_cols=Q_WIDTH)
        present.append(kv_flat)           # == torch layer_past [T, 2, nKV, D] (flat)
        # flash attention + fused o_proj.
        attn_out = flash_attention(q_flat, kv_flat, lp["w_o"], seg_ids, seg_row,
                                   seg_col, scale, n_heads=N_HEADS, n_kv=N_KV_HEADS,
                                   head_d=HEAD_SIZE)                    # [T, H]
        # fused: residual add + post-attn RMSNorm + gate/up + SwiGLU + down.
        hidden, residual = mlp_block(attn_out, residual, lp["post_ln"],
                                     lp["w_gate_up"], lp["w_down"])

    hidden = final_rmsnorm(hidden, residual, params["norm_w"])
    if lm_head_indices is not None:
        hidden = hidden[lm_head_indices]
    logits = linear(hidden, params["lm_head"])
    past_key_values = jnp.stack(present, axis=0).reshape(
        N_LAYERS, T, 2, N_KV_HEADS, HEAD_SIZE)                          # free reshape
    return logits, past_key_values


# ----------------------------- main -----------------------------
if __name__ == "__main__":
    key = jax.random.PRNGKey(0)
    pkey, ikey = jax.random.split(key)
    params = init_params(pkey)

    seq_len = 8
    n_seqs = 2
    T = seq_len * n_seqs
    input_ids = jax.random.randint(ikey, (T,), 0, VOCAB, dtype=jnp.int32)
    position_ids = jnp.tile(jnp.arange(seq_len, dtype=jnp.int32), n_seqs)
    cu_seqlens = jnp.array([0, seq_len, 2 * seq_len], dtype=jnp.int32)
    cu_seqlens_q = None
    max_s = seq_len
    lm_head_indices = jnp.array([seq_len - 1, 2 * seq_len - 1], dtype=jnp.int32)

    logits, present = flash_llama_forward(
        params, input_ids, position_ids, cu_seqlens, cu_seqlens_q, max_s, lm_head_indices
    )
    jax.block_until_ready((logits, present))
    assert logits.shape == (2, VOCAB), logits.shape
    assert present.shape == (N_LAYERS, T, 2, N_KV_HEADS, HEAD_SIZE), present.shape
    assert bool(jnp.all(jnp.isfinite(logits.astype(jnp.float32)))), "non-finite logits"
    print("KERNEL_OK")
</pallas_src>

<mosaic_0001>
module attributes {stable_mosaic.version = 11 : i64} {
  func.func @_qkv_rope_kernel(%arg0: i32, %arg1: memref<8x128xbf16, #tpu.memory_space<vmem>>, %arg2: memref<1x128xbf16, #tpu.memory_space<vmem>>, %arg3: memref<128x256xbf16, #tpu.memory_space<vmem>>, %arg4: memref<256x256xf32, #tpu.memory_space<vmem>>, %arg5: memref<8x256xf32, #tpu.memory_space<vmem>>, %arg6: memref<8x256xf32, #tpu.memory_space<vmem>>, %arg7: memref<8x128xbf16, #tpu.memory_space<vmem>>, %arg8: memref<8x128xbf16, #tpu.memory_space<vmem>>, %arg9: memref<8x128xbf16, #tpu.memory_space<vmem>>) attributes {dimension_semantics = [#tpu.dimension_semantics<parallel>], iteration_bounds = array<i64: 2>, scalar_prefetch = 0 : i64, scratch_operands = 0 : i64, tpu.core_type = #tpu.core_type<tc>, window_params = [{transform_indices = @transform_0, window_bounds = array<i64: 8, 128>}, {pipeline_mode = #tpu.pipeline_mode<synchronous>, transform_indices = @transform_1, window_bounds = array<i64: 1, 128>}, {pipeline_mode = #tpu.pipeline_mode<synchronous>, transform_indices = @transform_2, window_bounds = array<i64: 128, 256>}, {pipeline_mode = #tpu.pipeline_mode<synchronous>, transform_indices = @transform_3, window_bounds = array<i64: 256, 256>}, {transform_indices = @transform_4, window_bounds = array<i64: 8, 256>}, {transform_indices = @transform_5, window_bounds = array<i64: 8, 256>}, {transform_indices = @transform_6, window_bounds = array<i64: 8, 128>}, {transform_indices = @transform_7, window_bounds = array<i64: 8, 128>}, {transform_indices = @transform_8, window_bounds = array<i64: 8, 128>}]} {
    %c0 = arith.constant 0 : index
    %c0_0 = arith.constant 0 : index
    %0 = vector.load %arg1[%c0, %c0_0] : memref<8x128xbf16, #tpu.memory_space<vmem>>, vector<8x128xbf16>
    %1 = arith.extf %0 : vector<8x128xbf16> to vector<8x128xf32>
    %2 = arith.truncf %1 : vector<8x128xf32> to vector<8x128xbf16>
    %c0_1 = arith.constant 0 : index
    %c0_2 = arith.constant 0 : index
    %3 = vector.load %arg9[%c0_1, %c0_2] : memref<8x128xbf16, #tpu.memory_space<vmem>>, vector<8x128xbf16>
    tpu.vector_store %arg9[%c0_1, %c0_2], %2 {strides = array<i32>} : memref<8x128xbf16, #tpu.memory_space<vmem>>, vector<8x128xbf16>,
    %4 = arith.mulf %1, %1 : vector<8x128xf32>
    %cst = arith.constant dense<0.000000e+00> : vector<8xf32>
    %5 = vector.multi_reduction <add>, %4, %cst [1] : vector<8x128xf32> to vector<8xf32>
    %6 = vector.shape_cast %5 : vector<8xf32> to vector<8x1xf32>
    %cst_3 = arith.constant 1.280000e+02 : f32
    %7 = vector.broadcast %cst_3 : f32 to vector<8x1xf32>
    %8 = arith.divf %6, %7 : vector<8x1xf32>
    %cst_4 = arith.constant 9.99999997E-7 : f32
    %9 = vector.broadcast %cst_4 : f32 to vector<8x1xf32>
    %10 = arith.addf %8, %9 : vector<8x1xf32>
    %11 = math.rsqrt %10 : vector<8x1xf32>
    %12 = vector.broadcast %11 : vector<8x1xf32> to vector<8x128xf32>
    %13 = arith.mulf %1, %12 : vector<8x128xf32>
    %c0_5 = arith.constant 0 : index
    %c0_6 = arith.constant 0 : index
    %14 = vector.load %arg2[%c0_5, %c0_6] : memref<1x128xbf16, #tpu.memory_space<vmem>>, vector<1x128xbf16>
    %15 = arith.extf %14 : vector<1x128xbf16> to vector<1x128xf32>
    %16 = vector.broadcast %15 : vector<1x128xf32> to vector<8x128xf32>
    %17 = arith.mulf %13, %16 : vector<8x128xf32>
    %18 = arith.truncf %17 : vector<8x128xf32> to vector<8x128xbf16>
    %c0_7 = arith.constant 0 : index
    %c0_8 = arith.constant 0 : index
    %19 = vector.load %arg3[%c0_7, %c0_8] : memref<128x256xbf16, #tpu.memory_space<vmem>>, vector<128x256xbf16>
    %cst_9 = arith.constant dense<0.000000e+00> : vector<8x256xf32>
    %20 = tpu.matmul %18, %19, %cst_9 {dimension_numbers = #tpu.dot_dimension_numbers<[1], [0], [0], [1], [0, 0, 1, 1], [], []>} : vector<8x128xbf16>, vector<128x256xbf16>, vector<8x256xf32> -> vector<8x256xf32>
    %c0_10 = arith.constant 0 : index
    %c0_11 = arith.constant 0 : index
    %21 = vector.load %arg4[%c0_10, %c0_11] : memref<256x256xf32, #tpu.memory_space<vmem>>, vector<256x256xf32>
    %cst_12 = arith.constant dense<0.000000e+00> : vector<8x256xf32>
    %22 = tpu.matmul %20, %21, %cst_12 {dimension_numbers = #tpu.dot_dimension_numbers<[1], [0], [0], [1], [0, 0, 1, 1], [], []>} : vector<8x256xf32>, vector<256x256xf32>, vector<8x256xf32> -> vector<8x256xf32>
    %c0_13 = arith.constant 0 : index
    %c0_14 = arith.constant 0 : index
    %23 = vector.load %arg5[%c0_13, %c0_14] : memref<8x256xf32, #tpu.memory_space<vmem>>, vector<8x256xf32>
    %24 = arith.mulf %20, %23 : vector<8x256xf32>
    %c0_15 = arith.constant 0 : index
    %c0_16 = arith.constant 0 : index
    %25 = vector.load %arg6[%c0_15, %c0_16] : memref<8x256xf32, #tpu.memory_space<vmem>>, vector<8x256xf32>
    %26 = arith.mulf %22, %25 : vector<8x256xf32>
    %27 = arith.addf %24, %26 : vector<8x256xf32>
    %28 = vector.extract_strided_slice %27 {offsets = [0, 0], sizes = [8, 128], strides = [1, 1]} : vector<8x256xf32> to vector<8x128xf32>
    %29 = arith.truncf %28 : vector<8x128xf32> to vector<8x128xbf16>
    %c0_17 = arith.constant 0 : index
    %c0_18 = arith.constant 0 : index
    %30 = vector.load %arg7[%c0_17, %c0_18] : memref<8x128xbf16, #tpu.memory_space<vmem>>, vector<8x128xbf16>
    tpu.vector_store %arg7[%c0_17, %c0_18], %29 {strides = array<i32>} : memref<8x128xbf16, #tpu.memory_space<vmem>>, vector<8x128xbf16>,
    %31 = vector.extract_strided_slice %27 {offsets = [0, 128], sizes = [8, 128], strides = [1, 1]} : vector<8x256xf32> to vector<8x128xf32>
    %32 = arith.truncf %31 : vector<8x128xf32> to vector<8x128xbf16>
    %c0_19 = arith.constant 0 : index
    %c0_20 = arith.constant 0 : index
    %33 = vector.load %arg8[%c0_19, %c0_20] : memref<8x128xbf16, #tpu.memory_space<vmem>>, vector<8x128xbf16>
    tpu.vector_store %arg8[%c0_19, %c0_20], %32 {strides = array<i32>} : memref<8x128xbf16, #tpu.memory_space<vmem>>, vector<8x128xbf16>,
    return
  }
  func.func @transform_0(%arg0: i32) -> (i32, i32) {
    %c0_i32 = arith.constant 0 : i32
    %c0_i32_0 = arith.constant 0 : i32
    return %arg0, %c0_i32 : i32, i32
  }
  func.func @transform_1(%arg0: i32) -> (i32, i32) {
    %c0_i32 = arith.constant 0 : i32
    %c0_i32_0 = arith.constant 0 : i32
    %c0_i32_1 = arith.constant 0 : i32
    return %c0_i32, %c0_i32_0 : i32, i32
  }
  func.func @transform_2(%arg0: i32) -> (i32, i32) {
    %c0_i32 = arith.constant 0 : i32
    %c0_i32_0 = arith.constant 0 : i32
    %c0_i32_1 = arith.constant 0 : i32
    return %c0_i32, %c0_i32_0 : i32, i32
  }
  func.func @transform_3(%arg0: i32) -> (i32, i32) {
    %c0_i32 = arith.constant 0 : i32
    %c0_i32_0 = arith.constant 0 : i32
    %c0_i32_1 = arith.constant 0 : i32
    return %c0_i32, %c0_i32_0 : i32, i32
  }
  func.func @transform_4(%arg0: i32) -> (i32, i32) {
    %c0_i32 = arith.constant 0 : i32
    %c0_i32_0 = arith.constant 0 : i32
    return %arg0, %c0_i32 : i32, i32
  }
  func.func @transform_5(%arg0: i32) -> (i32, i32) {
    %c0_i32 = arith.constant 0 : i32
    %c0_i32_0 = arith.constant 0 : i32
    return %arg0, %c0_i32 : i32, i32
  }
  func.func @transform_6(%arg0: i32) -> (i32, i32) {
    %c0_i32 = arith.constant 0 : i32
    %c0_i32_0 = arith.constant 0 : i32
    return %arg0, %c0_i32 : i32, i32
  }
  func.func @transform_7(%arg0: i32) -> (i32, i32) {
    %c0_i32 = arith.constant 0 : i32
    %c0_i32_0 = arith.constant 0 : i32
    return %arg0, %c0_i32 : i32, i32
  }
  func.func @transform_8(%arg0: i32) -> (i32, i32) {
    %c0_i32 = arith.constant 0 : i32
    %c0_i32_0 = arith.constant 0 : i32
    return %arg0, %c0_i32 : i32, i32
  }
}

</mosaic_0001>

<bundles_post_ra>
// kernel: tpu_custom_call.1
= control target key start
LH: loop header
LB: loop body
LE: loop exit
PB: predicated region body
PF: predicated region fallthrough
CT: control target
= control target key end

     0   :  { %s1958_s0 = inlined_call_operand.hbm [shape: bf16[16,128], index: 0, kind: input, shape index: {}]   ;;  %s1959_s1 = inlined_call_operand.vmem [shape: bf16[1,128], index: 1, kind: input, shape index: {}]   ;;  %s1960_s2 = inlined_call_operand.hbm [shape: bf16[128,256], index: 2, kind: input, shape index: {}]   ;;  %s1961_s3 = inlined_call_operand.hbm [shape: f32[256,256], index: 3, kind: input, shape index: {}]   ;;  %s1962_s4 = inlined_call_operand.hbm [shape: f32[16,256], index: 4, kind: input, shape index: {}]   ;;  %s1963_s5 = inlined_call_operand.hbm [shape: f32[16,256], index: 5, kind: input, shape index: {}]   ;;  %s1964_s6 = inlined_call_operand.hbm [shape: bf16[16,128], index: 6, kind: output, shape index: {0}]   ;;  %s1965_s7 = inlined_call_operand.hbm [shape: bf16[16,128], index: 7, kind: output, shape index: {1}]   ;;  %s1966_s8 = inlined_call_operand.hbm [shape: bf16[16,128], index: 8, kind: output, shape index: {2}]  }
   0x1   :  { %1987 = sst [smem:[#allocation25_spill]] %s1960_s2 }
   0x2   :  { %1988 = sst [smem:[#allocation26_spill]] %s1962_s4 }
   0x3   :  { %1989 = sst [smem:[#allocation27_spill]] %s1966_s8 }
   0x4   :  { %14 = vsyncpa [#allocation3], 0 }
   0x5   :  { %16 = vsyncpa [#allocation3 + $0x1], 0 }
   0x6   :  { %17 = vsyncpa [#allocation6], 0 }
   0x7   :  { %18 = vsyncpa [#allocation9], 0 }
   0x8   :  { %20 = vsyncpa [#allocation9 + $0x1], 0 }
   0x9   :  { %21 = vsyncpa [#allocation4], 0 }
   0xa   :  { %23 = vsyncpa [#allocation4 + $0x1], 0 }
   0xb   :  { %24 = vsyncpa [#allocation13], 0 }
   0xc   :  { %26 = vsyncpa [#allocation13 + $0x1], 0  ;;  %s1560_s27 = smov 0   ;;  %s1562_s28 = smov 0  }
   0xd   :  { %s1564_s29 = smov 0   ;;  %s1566_s30 = smov 0  }
   0xe LB: > { %1990 = sst [smem:[#allocation20_spill]] %s1488_s27  ;;  %s1581_s9 = sadd.s32 4294967295, %s1500_s30   ;;  %s1500_s30 = sphi %s1566_s30, %s2024_s30   ;;  %s1496_s29 = sphi %s1564_s29, %s2026_s29   ;;  %s1492_s28 = sphi %s1562_s28, %s2028_s28   ;;  %s1488_s27 = sphi %s1560_s27, %s2027_s27  }
   0xf   : > { %1991 = sst [smem:[#allocation21_spill]] %s1496_s29  ;;  %s1968_s10 = sadd.s32 4294967294, %s1500_s30  }
  0x10   : > { %p52_p0 = scmp.ne.s32.totalorder %s1492_s28, %s1488_s27  ;;  %p1967_p1 = scmp.eq.s32.totalorder %s1581_s9, 0 }
  0x11   : > { %p197_p3 = scmp.eq.s32.totalorder %s1968_s10, 1  ;;  %p991_p5 = scmp.ge.s32.totalorder %s1500_s30, 1 }
  0x12   : > { %p1592_p4 = por %p1967_p1, %p52_p0  ;;  %p256_p7 = scmp.lt.s32.totalorder %s1500_s30, 3 }
  0x13   : > { %p1597_p6 = por %p197_p3, %p52_p0  ;;  %s1502_s14 = smov [#allocation5]  }
  0x14   : > { %s1992_s11 = scalar_select %p1592_p4, 1, 0 }
  0x15   : > { %s1993_s12 = scalar_select %p1597_p6, 1, 0 }
  0x16   : > { %p1602_p8 = pnand %p991_p5, %p256_p7  ;;  %s271_s15 = sshll.u32 %s1502_s14, 4  ;;  %s1606_s15 = int_to_ptr.vmem [resolvable:$true] %s271_s15 }
  0x17   : > { %1994 = sst [smem:[#allocation22_spill]] %s1993_s12  ;;  %s1618_s17 = sadd.s32 1, %s1500_s30  }
  0x18   : > { %s1995_s13 = scalar_select %p1602_p8, 1, 0 }
  0x19   : > { %p1122_p9 = pneg %p1602_p8  ;;  %1997 = sst [smem:[#allocation23_spill]] %s1618_s17 }
  0x1a   : > { %s39_s18 = sadd.s32 1, %s1496_s29  ;;  %s36_s19 = ssub.s32 %s1500_s30, %s1618_s17 }
  0x1b   : > { %p1613_p11 = pnand %p1122_p9, %p1967_p1  ;;  %s1998_s2 = sld [smem:[#allocation25_spill]] }
  0x1d   : > { %s1996_s16 = scalar_select %p1613_p11, 1, 0 }
  0x1e   : > { %p1972_p13 = pneg %p1613_p11 }
  0x21   : > { %s1220_s22 = scalar_lea.hbm %s1998_s2, 2048 }
  0x22   : > { %p1221_p12 = scmp.ne.s32.totalorder %s1998_s2, %s1220_s22  ;;  %p1227_p5 = scmp.lt.u32.totalorder %s1220_s22, %s1998_s2 }
  0x24   : > { %p1223_p0 = pnand %p1972_p13, %p1221_p12 }
  0x26   : > { %p1224_p3 = pneg %p1223_p0 }
  0x28   : > { %p1229_p7 = pnand %p1227_p5, %p1224_p3 }
  0x2a   : > { %1232 = shalt.err (!%p1229_p7)
}
  0x2b   : > { %s1233_s14 = scalar_lea.vmem %s1606_s15, 2048  ;;  %p1241_p2 = scmp.lt.s32.totalorder %s1606_s15, %s1606_s15 }
  0x2c   : > { %p1234_p9 = scmp.ne.s32.totalorder %s1606_s15, %s1233_s14  ;;  %p1242_p12 = scmp.lt.s32.totalorder %s1233_s14, %s1233_s14 }
  0x2e   : > { %p1236_p10 = pnand %p1234_p9, %p1972_p13  ;;  %p1243_p0 = por %p1242_p12, %p1241_p2 }
  0x30   : > { %p1237_p1 = pneg %p1236_p10 }
  0x32   : > { %p1244_p6 = pnand %p1243_p0, %p1237_p1 }
  0x34   : > { %1247 = shalt.err (!%p1244_p6)
}
  0x35   : > { %s1503_s20 = smov 128   ;;  %s1504_s21 = smov 8  }
  0x36   : > { %1125 = dma.hbm_to_vmem [thread:$0]  (!%p1613_p11), %s1998_s2, 2048, %s1606_s15, [#allocation6], %s1503_s20, %s1503_s20, %s1504_s21  }
  0x37   : > { %p37_p1 = scmp.eq.s32.totalorder %s36_s19, 0  ;;  %p46_p2 = scmp.ne.s32.totalorder %s1496_s29, %s1492_s28 }
  0x38   : > { %p47_p6 = scmp.eq.s32.totalorder %s1500_s30, 0  ;;  %p1151_p10 = scmp.lt.s32.totalorder %s1500_s30, 2 }
  0x39   : > { %s1655_s24 = scalar_select %p37_p1, %s1496_s29, %s39_s18  }
  0x3a   : > { %p48_p3 = por %p47_p6, %p46_p2  ;;  %p2000_p5 = scmp.eq.s32.totalorder %s1581_s9, 1 }
  0x3b   : > { %1999 = sst [smem:[#allocation24_spill]] %s1655_s24  ;;  %s1664_s26 = sand.u32 1, %s1496_s29  }
  0x3c   : > { %p1659_p7 = por %p2000_p5, %p46_p2  ;;  %s316_s14 = sand.u32 1, %s1500_s30  }
  0x3d   : > { %p1667_p9 = pnand %p1151_p10, %p48_p3  ;;  %s1970_s15 = sshll.u32 %s1664_s26, 4 }
  0x3e   : > { %s2001_s25 = scalar_select %p1659_p7, 1, 0 }
  0x3f   : > { %s2002_s22 = scalar_select %p1667_p9, 1, 0 }
  0x40   : > { %s1971_s19 = sshll.u32 %s1500_s30, 8  ;;  %s2003_s4 = sld [smem:[#allocation26_spill]] }
  0x41   : > { %s320_s23 = scalar_lea.vmem [#allocation8], %s1970_s15  ;;  %s1684_s2 = scalar_lea.sflag [#allocation9], %s316_s14 }
  0x42   : > { %s328_s10 = sshll.u32 %s320_s23, 4  ;;  %p1690_p0 = pneg %p1667_p9  ;;  %s1682_s10 = int_to_ptr.vmem [resolvable:$true] %s328_s10 }
  0x44   : > { %s2004_s29 = scalar_select %p1690_p0, 1, 0 }
  0x46   : > { %s1678_s21 = scalar_lea.hbm %s2003_s4, %s1971_s19  ;;  %s1253_s15 = scalar_lea.hbm %s2003_s4, 512 }
  0x47   : > { %s1248_s24 = scalar_lea.hbm %s1678_s21, 256  ;;  %p1254_p6 = scmp.lt.u32.totalorder %s1678_s21, %s2003_s4 }
  0x48   : > { %p1249_p12 = scmp.ne.s32.totalorder %s1678_s21, %s1248_s24  ;;  %p1255_p10 = scmp.lt.u32.totalorder %s1253_s15, %s1248_s24 }
  0x49   : > { %p1257_p5 = scmp.lt.u32.totalorder %s1248_s24, %s1678_s21 }
  0x4a   : > { %p1251_p1 = pnand %p1690_p0, %p1249_p12  ;;  %p1256_p3 = por %p1255_p10, %p1254_p6 }
  0x4c   : > { %p1252_p2 = pneg %p1251_p1  ;;  %p1258_p13 = por %p1257_p5, %p1256_p3 }
  0x4e   : > { %p1259_p7 = pnand %p1258_p13, %p1252_p2 }
  0x50   : > { %1262 = shalt.err (!%p1259_p7)
}
  0x51   : > { %s1263_s14 = scalar_lea.vmem %s1682_s10, 256  ;;  %s1505_s18 = smov [#allocation8]  }
  0x52   : > { %p1264_p12 = scmp.ne.s32.totalorder %s1682_s10, %s1263_s14  ;;  %s1268_s20 = sshll.u32 %s1505_s18, 4  ;;  %s1269_s20 = int_to_ptr.vmem [resolvable:$false] %s1268_s20 }
  0x53   : > { %s1270_s19 = scalar_lea.vmem %s1269_s20, 512  ;;  %p1271_p8 = scmp.lt.s32.totalorder %s1682_s10, %s1269_s20 }
  0x54   : > { %p1266_p1 = pnand %p1264_p12, %p1690_p0  ;;  %p1272_p11 = scmp.lt.s32.totalorder %s1270_s19, %s1263_s14 }
  0x56   : > { %p1267_p4 = pneg %p1266_p1  ;;  %p1273_p6 = por %p1272_p11, %p1271_p8 }
  0x58   : > { %p1274_p10 = pnand %p1273_p6, %p1267_p4 }
  0x5a   : > { %1277 = shalt.err (!%p1274_p10)
}
  0x5b   : > { %1135 = dma.hbm_to_vmem [thread:$0]  (!%p1667_p9), %s1678_s21, 256, %s1682_s10, %s1684_s2  }
  0x5c   : > { %s2005_s24 = sshll.u32 %s1500_s30, 8  ;;  %s1506_s4 = smov [#allocation7]  }
  0x5d   : > { %s1719_s18 = scalar_lea.hbm %s1963_s5, %s2005_s24  ;;  %s284_s20 = sshll.u32 %s1506_s4, 4  ;;  %s285_s20 = int_to_ptr.vmem [resolvable:$true] %s284_s20 }
  0x5e   : > { %s1278_s17 = scalar_lea.hbm %s1961_s3, 8192  ;;  %p2006_p8 = scmp.ne.s32.totalorder %s1996_s16, 0 }
  0x5f   : > { %p1279_p4 = scmp.ne.s32.totalorder %s1961_s3, %s1278_s17  ;;  %p1285_p2 = scmp.lt.u32.totalorder %s1278_s17, %s1961_s3 }
  0x60   : > { %p2007_p11 = pneg %p2006_p8 }
  0x62   : > { %p1281_p13 = pnand %p1279_p4, %p2007_p11 }
  0x64   : > { %p1282_p7 = pneg %p1281_p13 }
  0x66   : > { %p1287_p3 = pnand %p1285_p2, %p1282_p7 }
  0x68   : > { %1290 = shalt.err (!%p1287_p3)
}
  0x69   : > { %s1291_s4 = scalar_lea.vmem %s285_s20, 8192  ;;  %p2008_p12 = pmov %p2007_p11 }
  0x6a   : > { %p1292_p5 = scmp.ne.s32.totalorder %s285_s20, %s1291_s4  ;;  %p1299_p10 = scmp.lt.s32.totalorder %s285_s20, %s285_s20 }
  0x6b   : > { %p1300_p9 = scmp.lt.s32.totalorder %s1291_s4, %s1291_s4 }
  0x6c   : > { %p1294_p1 = pnand %p1292_p5, %p2008_p12 }
  0x6d   : > { %p1301_p0 = por %p1300_p9, %p1299_p10 }
  0x6e   : > { %p1295_p6 = pneg %p1294_p1 }
  0x70   : > { %p1302_p4 = pnand %p1301_p0, %p1295_p6 }
  0x72   : > { %1305 = shalt.err (!%p1302_p4)
}
  0x73   : > { %s1507_s27 = smov 256   ;;  %s1508_s12 = smov 16  }
  0x74   : > { %1128 = dma.hbm_to_vmem [thread:$0]  (!%p2006_p8), %s1961_s3, 8192, %s285_s20, [#allocation6], %s1507_s27, %s1507_s27, %s1508_s12  }
  0x75   : > { %s995_s15 = sshll.u32 %s1664_s26, 2  ;;  %s996_s23 = sshll.u32 %s1500_s30, 6 }
  0x76   : > { %s1746_s10 = scalar_lea.hbm %s1958_s0, %s996_s23  ;;  %s302_s21 = scalar_lea.vmem [#allocation2], %s995_s15 }
  0x77   : > { %s309_s4 = sshll.u32 %s302_s21, 4  ;;  %s2009_s16 = sshll.u32 %s1664_s26, 4  ;;  %s1748_s4 = int_to_ptr.vmem [resolvable:$true] %s309_s4 }
  0x78   : > { %s1752_s8 = scalar_lea.vmem [#allocation10], %s2009_s16  ;;  %s299_s27 = scalar_lea.sflag [#allocation3], %s1664_s26 }
  0x79   : > { %s347_s20 = sshll.u32 %s1752_s8, 4  ;;  %s1306_s12 = scalar_lea.hbm %s1746_s10, 64  ;;  %s348_s20 = int_to_ptr.vmem [resolvable:$true] %s347_s20 }
  0x7a   : > { %p1307_p9 = scmp.ne.s32.totalorder %s1746_s10, %s1306_s12  ;;  %p2010_p0 = scmp.ne.s32.totalorder %s2004_s29, 0 }
  0x7b   : > { %s1311_s23 = scalar_lea.hbm %s1958_s0, 128  ;;  %p1312_p13 = scmp.lt.u32.totalorder %s1746_s10, %s1958_s0 }
  0x7c   : > { %p1309_p8 = pnand %p1307_p9, %p2010_p0  ;;  %p1313_p7 = scmp.lt.u32.totalorder %s1311_s23, %s1306_s12 }
  0x7d   : > { %p1315_p3 = scmp.lt.u32.totalorder %s1306_s12, %s1746_s10 }
  0x7e   : > { %p1310_p11 = pneg %p1309_p8  ;;  %p1314_p2 = por %p1313_p7, %p1312_p13 }
  0x80   : > { %p1316_p5 = por %p1315_p3, %p1314_p2 }
  0x82   : > { %p1317_p12 = pnand %p1316_p5, %p1310_p11 }
  0x84   : > { %1320 = shalt.err (!%p1317_p12)
}
  0x85   : > { %s1321_s26 = scalar_lea.vmem %s1748_s4, 64  ;;  %s1509_s19 = smov [#allocation2]  }
  0x86   : > { %p1322_p1 = scmp.ne.s32.totalorder %s1748_s4, %s1321_s26  ;;  %s1326_s21 = sshll.u32 %s1509_s19, 4  ;;  %s1327_s21 = int_to_ptr.vmem [resolvable:$false] %s1326_s21 }
  0x87   : > { %s1328_s16 = scalar_lea.vmem %s1327_s21, 128  ;;  %p1329_p4 = scmp.lt.s32.totalorder %s1748_s4, %s1327_s21 }
  0x88   : > { %p1324_p6 = pnand %p1322_p1, %p2010_p0  ;;  %p1330_p9 = scmp.lt.s32.totalorder %s1328_s16, %s1321_s26 }
  0x8a   : > { %p1325_p10 = pneg %p1324_p6  ;;  %p1331_p8 = por %p1330_p9, %p1329_p4 }
  0x8c   : > { %p1332_p13 = pnand %p1331_p8, %p1325_p10 }
  0x8e   : > { %1335 = shalt.err (!%p1332_p13)
}
  0x8f   : > { %p2011_p11 = scmp.ne.s32.totalorder %s2002_s22, 0  ;;  %s1336_s12 = scalar_lea.hbm %s1719_s18, 256 }
  0x90   : > { %p1337_p7 = scmp.ne.s32.totalorder %s1719_s18, %s1336_s12  ;;  %s1341_s23 = scalar_lea.hbm %s1963_s5, 512 }
  0x91   : > { %1132 = dma.hbm_to_vmem [thread:$0]  (!%p2011_p11), %s1746_s10, 64, %s1748_s4, %s299_s27  }
  0x92   : > { %p1339_p2 = pnand %p1337_p7, %p2010_p0  ;;  %p1342_p5 = scmp.lt.u32.totalorder %s1719_s18, %s1963_s5 }
  0x93   : > { %p1343_p12 = scmp.lt.u32.totalorder %s1341_s23, %s1336_s12  ;;  %p1345_p6 = scmp.lt.u32.totalorder %s1336_s12, %s1719_s18 }
  0x94   : > { %p1340_p3 = pneg %p1339_p2 }
  0x95   : > { %p1344_p1 = por %p1343_p12, %p1342_p5 }
  0x97   : > { %p1346_p10 = por %p1345_p6, %p1344_p1 }
  0x99   : > { %p1347_p4 = pnand %p1346_p10, %p1340_p3 }
  0x9b   : > { %1350 = shalt.err (!%p1347_p4)
}
  0x9c   : > { %s1351_s8 = scalar_lea.vmem %s348_s20, 256  ;;  %s1510_s10 = smov [#allocation10]  }
  0x9d   : > { %p1352_p9 = scmp.ne.s32.totalorder %s348_s20, %s1351_s8  ;;  %s1356_s4 = sshll.u32 %s1510_s10, 4  ;;  %s1357_s4 = int_to_ptr.vmem [resolvable:$false] %s1356_s4 }
  0x9e   : > { %s1358_s27 = scalar_lea.vmem %s1357_s4, 512  ;;  %p1359_p7 = scmp.lt.s32.totalorder %s348_s20, %s1357_s4 }
  0x9f   : > { %p1354_p8 = pnand %p1352_p9, %p2010_p0  ;;  %p1360_p2 = scmp.lt.s32.totalorder %s1358_s27, %s1351_s8 }
  0xa1   : > { %p1355_p13 = pneg %p1354_p8  ;;  %p1361_p11 = por %p1360_p2, %p1359_p7 }
  0xa3   : > { %p1362_p5 = pnand %p1361_p11, %p1355_p13 }
  0xa5   : > { %1365 = shalt.err (!%p1362_p5)
}
  0xa6   : > { %p2012_p12 = scmp.ne.s32.totalorder %s2002_s22, 0  ;;  %p2013_p3 = scmp.ne.s32.totalorder %s1995_s13, 0 }
  0xa7   : > { %s1800_s29 = sand.u32 (!%p2013_p3), 1, %s1492_s28   ;;  %p2014_p0 = scmp.ne.s32.totalorder (!%p2013_p3), %s1992_s11, 0 }
  0xa8   : > { %1138 = dma.hbm_to_vmem [thread:$0]  (!%p2012_p12), %s1719_s18, 256, %s348_s20, %s1684_s2  }
  0xa9   : > { %356 = sbr.rel (%p2013_p3) target bundleno = 843 (0x34b), region = 44  ;;  %s1803_s26 = sshll.u32 (!%p2013_p3), %s1800_s29, 2 }
  0xaa   : > { %s359_s19 = scalar_lea.sflag (!%p2013_p3), [#allocation3], %s1800_s29  ;;  %s362_s21 = scalar_lea.vmem (!%p2013_p3), [#allocation2], %s1803_s26 }
  0xb0   : > { %1467 = dma.done.wait (%p2014_p0), %s359_s19, 64  }
  0xb1   : > { %1469 = vsyncadd (%p2014_p0), %s359_s19, 4294967232  ;;  %p2015_p11 = scmp.eq.s32.totalorder %s1581_s9, 0 }
  0xb3   : > { %1471 = dma.done.wait (%p2015_p11), [#allocation6], 10240   ;;  %p2016_p1 = pmov %p2015_p11 }
  0xb4   : > { %s375_s2 = sand.u32 1, %s1581_s9   ;;  %s1007_s13 = sshll.u32 %s1800_s29, 4 }
  0xb5   : > { %1473 = vsyncadd (%p2016_p1), [#allocation6], 4294957056  ;;  %s376_s22 = scalar_lea.sflag [#allocation9], %s375_s2  ;;  %s1821_s18 = scalar_lea.vmem [#allocation8], %s1007_s13 }
  0xb6   : > { %1475 = dma.done.wait (%p2014_p0), %s376_s22, 512  }
  0xb7   : > { %1477 = vsyncadd (%p2014_p0), %s376_s22, 4294966784  ;;  %v442_v0 = vld [vmem:[%s362_s21] sm:$0xf]  ;;  %s440_s20 = scalar_lea.vmem [#allocation14], %s1803_s26  ;;  %v1194_v2 = vld [vmem:[#allocation5 + $0x4] ss:$8 sps:$4 sm:$0xff]  }
  0xb8   : > { %v1827_v1 = vunpack.c.l.bf16 %v442_v0  ;;  %444 = vst [vmem:[%s440_s20] sm:$0xf] %v442_v0  ;;  %v1196_v3 = vld [vmem:[#allocation5] ss:$8 sps:$4 sm:$0xff]   ;;  %v1197_v4 = vld [vmem:[#allocation5 + $0x14] ss:$8 sps:$4 sm:$0xff]   ;;  %557 = vmatprep.subr.bf16.mxu0 %v1194_v2  ;;  %v1511_v16 = vmov 0  }
  0xb9   : > { %v1199_v6 = vld [vmem:[#allocation5 + $0x10] ss:$8 sps:$4 sm:$0xff]   ;;  %558 = vmatpush1.bf16.msra.mxu0 %v1196_v3  ;;  %v1200_v7 = vld [vmem:[#allocation5 + $0x24] ss:$8 sps:$4 sm:$0xff]   ;;  %v1202_v8 = vld [vmem:[#allocation5 + $0x20] ss:$8 sps:$4 sm:$0xff]   ;;  %589 = vmatprep.mubr.bf16.mxu0 %v1511_v16 }
  0xba   : > { %v445_v5 = vmul.f32 %v1827_v1, %v1827_v1  ;;  %559 = vmatprep.subr.bf16.mxu0 %v1197_v4  ;;  %v1203_v9 = vld [vmem:[#allocation5 + $0x34] ss:$8 sps:$4 sm:$0xff]   ;;  %v1205_v10 = vld [vmem:[#allocation5 + $0x30] ss:$8 sps:$4 sm:$0xff]   ;;  %v1206_v11 = vld [vmem:[#allocation5 + $0x44] ss:$8 sps:$4 sm:$0xff]  }
  0xbb   : > { %v1208_v12 = vld [vmem:[#allocation5 + $0x40] ss:$8 sps:$4 sm:$0xff]   ;;  %v1209_v13 = vld [vmem:[#allocation5 + $0x54] ss:$8 sps:$4 sm:$0xff]   ;;  %v1211_v14 = vld [vmem:[#allocation5 + $0x50] ss:$8 sps:$4 sm:$0xff]  }
  0xbc   : > { %446 = vadd.xlane.f32.xlu0 %v445_v5  ;;  %v1212_v15 = vld [vmem:[#allocation5 + $0x64] ss:$8 sps:$4 sm:$0xff]   ;;  %v1214_v17 = vld [vmem:[#allocation5 + $0x60] ss:$8 sps:$4 sm:$0xff]   ;;  %v1215_v18 = vld [vmem:[#allocation5 + $0x74] ss:$8 sps:$4 sm:$0xff]  }
  0xbd   : > { %560 = vmatpush1.bf16.msra.mxu0 %v1199_v6  ;;  %v1217_v19 = vld [vmem:[#allocation5 + $0x70] ss:$8 sps:$4 sm:$0xff]   ;;  %v599_v20 = vld [vmem:[#allocation7 + $0x8] sm:$0xff]  ;;  %v598_v22 = vld [vmem:[#allocation7] sm:$0xff]  ;;  %s388_s12 = scalar_lea.vmem [#allocation10], %s1007_s13  ;;  %s1031_s17 = sshll.u32 %s1581_s9, 6 }
  0xbe   : > { %561 = vmatprep.subr.bf16.mxu0 %v1200_v7  ;;  %v601_v21 = vld [vmem:[#allocation7 + $0x18] sm:$0xff]  ;;  %v600_v24 = vld [vmem:[#allocation7 + $0x10] sm:$0xff]  ;;  %v603_v25 = vld [vmem:[#allocation7 + $0x28] sm:$0xff]  ;;  %s426_s24 = scalar_lea.vmem [#allocation11], %s1803_s26  ;;  %s797_s14 = sshll.u32 %s440_s20, 4  ;;  %s1866_s14 = int_to_ptr.vmem [resolvable:$true] %s797_s14 }
  0xbf   : > { %v1038_v23 = vpack.c.bf16 %v601_v21, %v599_v20  ;;  %v605_v26 = vld [vmem:[#allocation7 + $0x38] sm:$0xff]  ;;  %v1040_v27 = vpack.c.bf16 %v600_v24, %v598_v22  ;;  %v602_v29 = vld [vmem:[#allocation7 + $0x20] sm:$0xff]  ;;  %v604_v30 = vld [vmem:[#allocation7 + $0x30] sm:$0xff]  ;;  %s771_s23 = sshll.u32 %s426_s24, 4  ;;  %s433_s15 = scalar_lea.vmem [#allocation12], %s1803_s26  ;;  %s1852_s23 = int_to_ptr.vmem [resolvable:$true] %s771_s23 }
  0xc0   : > { %v1042_v28 = vpack.c.bf16 %v605_v26, %v603_v25  ;;  %v607_v31 = vld [vmem:[#allocation7 + $0x48] sm:$0xff]  ;;  %v609_v32 = vld [vmem:[#allocation7 + $0x58] sm:$0xff]  ;;  %v1044_v33 = vpack.c.bf16 %v604_v30, %v602_v29  ;;  %v606_v35 = vld [vmem:[#allocation7 + $0x40] sm:$0xff]  ;;  %s784_s8 = sshll.u32 %s433_s15, 4  ;;  %s1850_s27 = scalar_lea.hbm %s1964_s6, %s1031_s17  ;;  %s1859_s8 = int_to_ptr.vmem [resolvable:$true] %s784_s8 }
  0xc1   : > { %562 = vmatpush1.bf16.msra.mxu0 %v1202_v8  ;;  %1039 = vmatprep.subr.bf16.mxu1 %v1038_v23  ;;  %v1046_v34 = vpack.c.bf16 %v609_v32, %v607_v31  ;;  %v608_v36 = vld [vmem:[#allocation7 + $0x50] sm:$0xff]  ;;  %v611_v37 = vld [vmem:[#allocation7 + $0x68] sm:$0xff]  ;;  %v613_v38 = vld [vmem:[#allocation7 + $0x78] sm:$0xff]  ;;  %s1857_s13 = scalar_lea.hbm %s1965_s7, %s1031_s17  ;;  %s748_s11 = scalar_lea.sflag [#allocation4], %s1800_s29 }
  0xc2   : > { %563 = vmatprep.subr.bf16.mxu0 %v1203_v9  ;;  %1041 = vmatpush1.bf16.msra.mxu1 %v1040_v27  ;;  %v1048_v39 = vpack.c.bf16 %v608_v36, %v606_v35  ;;  %v1050_v40 = vpack.c.bf16 %v613_v38, %v611_v37  ;;  %v610_v41 = vld [vmem:[#allocation7 + $0x60] sm:$0xff]  ;;  %v612_v42 = vld [vmem:[#allocation7 + $0x70] sm:$0xff]  ;;  %v615_v43 = vld [vmem:[#allocation7 + $0x88] sm:$0xff]  ;;  %s1366_s16 = scalar_lea.vmem %s1852_s23, 64  ;;  %p2018_p10 = scmp.ne.s32.totalorder %s2001_s25, 0 }
  0xc3   : > { %1043 = vmatprep.subr.bf16.mxu1 %v1042_v28  ;;  %v617_v44 = vld [vmem:[#allocation7 + $0x98] sm:$0xff]  ;;  %v1052_v45 = vpack.c.bf16 %v612_v42, %v610_v41  ;;  %v614_v47 = vld [vmem:[#allocation7 + $0x80] sm:$0xff]  ;;  %v616_v48 = vld [vmem:[#allocation7 + $0x90] sm:$0xff]  ;;  %p1367_p6 = scmp.ne.s32.totalorder %s1852_s23, %s1366_s16 }
  0xc4   : > { %v1054_v46 = vpack.c.bf16 %v617_v44, %v615_v43  ;;  %v619_v49 = vld [vmem:[#allocation7 + $0xa8] sm:$0xff]  ;;  %v621_v50 = vld [vmem:[#allocation7 + $0xb8] sm:$0xff]  ;;  %v1056_v51 = vpack.c.bf16 %v616_v48, %v614_v47  ;;  %v618_v53 = vld [vmem:[#allocation7 + $0xa0] sm:$0xff] }
  0xc5   : > { %564 = vmatpush1.bf16.msra.mxu0 %v1205_v10  ;;  %v1058_v52 = vpack.c.bf16 %v621_v50, %v619_v49  ;;  %v620_v54 = vld [vmem:[#allocation7 + $0xb0] sm:$0xff]  ;;  %v623_v55 = vld [vmem:[#allocation7 + $0xc8] sm:$0xff]  ;;  %v625_v56 = vld [vmem:[#allocation7 + $0xd8] sm:$0xff]  ;;  %p1368_p4 = pnand %p1367_p6, %p2018_p10 }
  0xc6   : > { %565 = vmatprep.subr.bf16.mxu0 %v1206_v11  ;;  %1045 = vmatpush1.bf16.msra.mxu1 %v1044_v33  ;;  %v1060_v57 = vpack.c.bf16 %v620_v54, %v618_v53  ;;  %v1062_v58 = vpack.c.bf16 %v625_v56, %v623_v55  ;;  %v622_v59 = vld [vmem:[#allocation7 + $0xc0] sm:$0xff]  ;;  %v624_v60 = vld [vmem:[#allocation7 + $0xd0] sm:$0xff]  ;;  %v627_v61 = vld [vmem:[#allocation7 + $0xe8] sm:$0xff] }
  0xc7   : > { %1047 = vmatprep.subr.bf16.mxu1 %v1046_v34  ;;  %v629_v62 = vld [vmem:[#allocation7 + $0xf8] sm:$0xff]  ;;  %v1064_v63 = vpack.c.bf16 %v624_v60, %v622_v59  ;;  %v626_v2 = vld [vmem:[#allocation7 + $0xe0] sm:$0xff]  ;;  %v628_v3 = vld [vmem:[#allocation7 + $0xf0] sm:$0xff]  ;;  %p1369_p9 = pneg %p1368_p4 }
  0xc8   : > { %v1066_v0 = vpack.c.bf16 %v629_v62, %v627_v61  ;;  %v631_v4 = vld [vmem:[#allocation7 + $0x108] sm:$0xff]  ;;  %v633_v5 = vld [vmem:[#allocation7 + $0x118] sm:$0xff]  ;;  %v1068_v6 = vpack.c.bf16 %v628_v3, %v626_v2  ;;  %v630_v8 = vld [vmem:[#allocation7 + $0x100] sm:$0xff] }
  0xc9   : > { %566 = vmatpush1.bf16.msra.mxu0 %v1208_v12  ;;  %v1070_v7 = vpack.c.bf16 %v633_v5, %v631_v4  ;;  %v632_v9 = vld [vmem:[#allocation7 + $0x110] sm:$0xff]  ;;  %v635_v10 = vld [vmem:[#allocation7 + $0x128] sm:$0xff]  ;;  %v637_v11 = vld [vmem:[#allocation7 + $0x138] sm:$0xff] }
  0xca   : > { %567 = vmatprep.subr.bf16.mxu0 %v1209_v13  ;;  %1049 = vmatpush1.bf16.msra.mxu1 %v1048_v39  ;;  %v1072_v12 = vpack.c.bf16 %v632_v9, %v630_v8  ;;  %v1074_v13 = vpack.c.bf16 %v637_v11, %v635_v10  ;;  %v639_v16 = vld [vmem:[#allocation7 + $0x148] sm:$0xff]  ;;  %v638_v20 = vld [vmem:[#allocation7 + $0x140] sm:$0xff]  ;;  %v640_v21 = vld [vmem:[#allocation7 + $0x150] sm:$0xff] }
  0xcb   : > { %1051 = vmatprep.subr.bf16.mxu1 %v1050_v40  ;;  %v643_v22 = vld [vmem:[#allocation7 + $0x168] sm:$0xff]  ;;  %v645_v23 = vld [vmem:[#allocation7 + $0x178] sm:$0xff]  ;;  %v1080_v24 = vpack.c.bf16 %v640_v21, %v638_v20  ;;  %v642_v26 = vld [vmem:[#allocation7 + $0x160] sm:$0xff] }
  0xcc   : > { %v1082_v25 = vpack.c.bf16 %v645_v23, %v643_v22  ;;  %v644_v27 = vld [vmem:[#allocation7 + $0x170] sm:$0xff]  ;;  %v647_v28 = vld [vmem:[#allocation7 + $0x188] sm:$0xff]  ;;  %v649_v29 = vld [vmem:[#allocation7 + $0x198] sm:$0xff] }
  0xcd   : > { %568 = vmatpush1.bf16.msra.mxu0 %v1211_v14  ;;  %v634_v14 = vld [vmem:[#allocation7 + $0x120] sm:$0xff]  ;;  %v1084_v30 = vpack.c.bf16 %v644_v27, %v642_v26  ;;  %v1086_v31 = vpack.c.bf16 %v649_v29, %v647_v28  ;;  %v648_v33 = vld [vmem:[#allocation7 + $0x190] sm:$0xff]  ;;  %v651_v34 = vld [vmem:[#allocation7 + $0x1a8] sm:$0xff] }
  0xce   : > { %569 = vmatprep.subr.bf16.mxu0 %v1212_v15  ;;  %1053 = vmatpush1.bf16.msra.mxu1 %v1052_v45  ;;  %v636_v15 = vld [vmem:[#allocation7 + $0x130] sm:$0xff]  ;;  %v646_v32 = vld [vmem:[#allocation7 + $0x180] sm:$0xff]  ;;  %v653_v35 = vld [vmem:[#allocation7 + $0x1b8] sm:$0xff] }
  0xcf   : > { %1055 = vmatprep.subr.bf16.mxu1 %v1054_v46  ;;  %v1088_v36 = vpack.c.bf16 %v648_v33, %v646_v32  ;;  %v1090_v37 = vpack.c.bf16 %v653_v35, %v651_v34  ;;  %v650_v38 = vld [vmem:[#allocation7 + $0x1a0] sm:$0xff]  ;;  %v652_v39 = vld [vmem:[#allocation7 + $0x1b0] sm:$0xff]  ;;  %v655_v40 = vld [vmem:[#allocation7 + $0x1c8] sm:$0xff] }
  0xd0   : > { %v657_v41 = vld [vmem:[#allocation7 + $0x1d8] sm:$0xff]  ;;  %v1092_v42 = vpack.c.bf16 %v652_v39, %v650_v38  ;;  %v654_v44 = vld [vmem:[#allocation7 + $0x1c0] sm:$0xff]  ;;  %v656_v45 = vld [vmem:[#allocation7 + $0x1d0] sm:$0xff] }
  0xd1   : > { %570 = vmatpush1.bf16.msra.mxu0 %v1214_v17  ;;  %v641_v17 = vld [vmem:[#allocation7 + $0x158] sm:$0xff]  ;;  %v1094_v43 = vpack.c.bf16 %v657_v41, %v655_v40  ;;  %v659_v46 = vld [vmem:[#allocation7 + $0x1e8] sm:$0xff]  ;;  %v1096_v48 = vpack.c.bf16 %v656_v45, %v654_v44 }
  0xd2   : > { %571 = vmatprep.subr.bf16.mxu0 %v1215_v18  ;;  %1057 = vmatpush1.bf16.msra.mxu1 %v1056_v51  ;;  %v1076_v18 = vpack.c.bf16 %v636_v15, %v634_v14  ;;  %v661_v47 = vld [vmem:[#allocation7 + $0x1f8] sm:$0xff] }
  0xd3   : > { %1059 = vmatprep.subr.bf16.mxu1 %v1058_v52  ;;  %v1098_v49 = vpack.c.bf16 %v661_v47, %v659_v46  ;;  %v455_v52 = vlaneseq  ;;  %v453_v55 = vld [vmem:[%s1959_s1] sm:$0x1] }
  0xd4   : > { %v454_v56 = vunpack.c.l.bf16 %v453_v55  ;;  %v734_v8 = vld [vmem:[%s1821_s18 + $0x8] sm:$0xff] }
  0xd5   : > { %572 = vmatpush1.bf16.msra.mxu0 %v1217_v19  ;;  %v1078_v19 = vpack.c.bf16 %v641_v17, %v639_v16  ;;  %v456_v54 = vshrl.u32 %v455_v52, 7  ;;  %v738_v9 = vld [vmem:[%s388_s12 + $0x8] sm:$0xff] }
  0xd6   : > { %1061 = vmatpush1.bf16.msra.mxu1 %v1060_v57 }
  0xd7   : > { %1063 = vmatprep.subr.bf16.mxu1 %v1062_v58  ;;  %v457_v57 = vsub.s32 0, %v456_v54 }
  0xd9   : > { %v458_v58 = vrot.slane %v454_v56, %v457_v57 }
  0xda   : > { %1065 = vmatpush1.bf16.msra.mxu1 %v1064_v63  ;;  %v658_v63 = vld [vmem:[#allocation7 + $0x1e0] sm:$0xff] }
  0xdb   : > { %1067 = vmatprep.subr.bf16.mxu1 %v1066_v0  ;;  %v660_v0 = vld [vmem:[#allocation7 + $0x1f0] sm:$0xff] }
  0xdc   : > { %v1100_v2 = vpack.c.bf16 %v660_v0, %v658_v63 }
  0xde   : > { %1069 = vmatpush1.bf16.msra.mxu1 %v1068_v6 }
  0xdf   : > { %1071 = vmatprep.subr.bf16.mxu1 %v1070_v7  ;;  %v733_v7 = vld [vmem:[%s1821_s18] sm:$0xff]  ;;  %s2017_s18 = sld [smem:[#allocation27_spill]] }
  0xe2   : > { %1073 = vmatpush1.bf16.msra.mxu1 %v1072_v12 }
  0xe3   : > { %1075 = vmatprep.subr.bf16.mxu1 %v1074_v13 }
  0xe5   : > { %s1864_s20 = scalar_lea.hbm %s2017_s18, %s1031_s17 }
  0xe6   : > { %1077 = vmatpush1.bf16.msra.mxu1 %v1076_v18 }
  0xe7   : > { %1079 = vmatprep.subr.bf16.mxu1 %v1078_v19 }
  0xea   : > { %1081 = vmatpush1.bf16.msra.mxu1 %v1080_v24 }
  0xeb   : > { %1083 = vmatprep.subr.bf16.mxu1 %v1082_v25 }
  0xee   : > { %1085 = vmatpush1.bf16.msra.mxu1 %v1084_v30 }
  0xef   : > { %1087 = vmatprep.subr.bf16.mxu1 %v1086_v31 }
  0xf2   : > { %1089 = vmatpush1.bf16.msra.mxu1 %v1088_v36 }
  0xf3   : > { %1091 = vmatprep.subr.bf16.mxu1 %v1090_v37 }
  0xf6   : > { %1093 = vmatpush1.bf16.msra.mxu1 %v1092_v42 }
  0xf7   : > { %1095 = vmatprep.subr.bf16.mxu1 %v1094_v43 }
  0xfa   : > { %1097 = vmatpush1.bf16.msra.mxu1 %v1096_v48 }
  0xfb   : > { %1099 = vmatprep.subr.bf16.mxu1 %v1098_v49 }
  0xfe   : > { %1101 = vmatpush1.bf16.msra.mxu1 %v1100_v2 }
 0x149   : > { %v447_v50 = vpop.xlane.xlu0 %446 }
 0x14a   : > { %v449_v51 = vmul.f32 0.0078125, %v447_v50 }
 0x14c   : > { %v450_v53 = vadd.f32 1e-06, %v449_v51 }
 0x14e   : > { %1218 = vrsqrt.f32 %v450_v53 }
 0x158   : > { %v1219_v59 = vpop.eup %1218 }
 0x159   : > { %v452_v60 = vmul.f32 %v1219_v59, %v1827_v1  ;;  %v737_v1 = vld [vmem:[%s388_s12] sm:$0xff]  ;;  %s1512_s12 = smov [#allocation11]  }
 0x15a   : > { %s1370_s10 = sshll.u32 %s1512_s12, 4  ;;  %s1371_s10 = int_to_ptr.vmem [resolvable:$false] %s1370_s10 }
 0x15b   : > { %v459_v61 = vmul.f32 %v458_v58, %v452_v60  ;;  %s1372_s4 = scalar_lea.vmem %s1371_s10, 128  ;;  %p1373_p8 = scmp.lt.s32.totalorder %s1852_s23, %s1371_s10 }
 0x15c   : > { %p1374_p13 = scmp.lt.s32.totalorder %s1372_s4, %s1366_s16 }
 0x15d   : > { %v460_v62 = vpack.c.bf16 %v459_v61, %v459_v61 }
 0x15e   : > { %p1375_p7 = por %p1374_p13, %p1373_p8 }
 0x15f   : > { %590 = vmatmul.mubr.bf16.vlgmr.msra.gmra.mrb[0].mxu0 %v460_v62 }
 0x160   : > { %p1376_p2 = pnand %p1375_p7, %p1369_p9 }
 0x232   : > { %v591_v3 = vpop.f32.mrb[0].mxu0 }
 0x233   : > { %v593_v4 = vpop.f32.mrb[1].mxu0  ;;  %v735_v11 = vmul.f32 %v733_v7, %v591_v3 }
 0x234   : > { %v595_v5 = vpop.f32.mrb[2].mxu0  ;;  %726 = vmatprep.mubr.f32.mxu1 %v593_v4  ;;  %v736_v14 = vmul.f32 %v734_v8, %v593_v4 }
 0x235   : > { %v596_v6 = vpop.f32.mrb[3].mxu0  ;;  %727 = vmatmul.mubr.f32.vlgmr.msra.gmra.mrb[0].mxu1 %v591_v3 }
 0x308   : > { %v728_v10 = vpop.f32.mrb[0].mxu1 }
 0x309   : > { %v739_v12 = vmul.f32 %v737_v1, %v728_v10  ;;  %v730_v13 = vpop.f32.mrb[1].mxu1 }
 0x30a   : > { %v740_v15 = vmul.f32 %v738_v9, %v730_v13 }
 0x30b   : > { %v741_v16 = vadd.f32 %v739_v12, %v735_v11 }
 0x30c   : > { %v742_v17 = vadd.f32 %v740_v15, %v736_v14 }
 0x30d   : > { %v743_v18 = vpack.c.bf16 %v741_v16, %v741_v16 }
 0x30e   : > { %v745_v19 = vpack.c.bf16 %v742_v17, %v742_v17 }
 0x30f   : > { %744 = vst [vmem:[%s426_s24] sm:$0xf] %v743_v18 }
 0x310   : > { %746 = vst [vmem:[%s433_s15] sm:$0xf] %v745_v19 }
 0x311   : > { %1379 = shalt.err (!%p1376_p2)
}
 0x312   : > { %s1380_s29 = scalar_lea.hbm %s1850_s27, 64  ;;  %s1384_s15 = scalar_lea.hbm %s1964_s6, 128 }
 0x313   : > { %p1381_p5 = scmp.ne.s32.totalorder %s1850_s27, %s1380_s29  ;;  %p1385_p0 = scmp.lt.u32.totalorder %s1850_s27, %s1964_s6 }
 0x314   : > { %p1386_p11 = scmp.lt.u32.totalorder %s1384_s15, %s1380_s29  ;;  %p1388_p6 = scmp.lt.u32.totalorder %s1380_s29, %s1850_s27 }
 0x315   : > { %p1382_p12 = pnand %p1381_p5, %p2018_p10 }
 0x316   : > { %p1387_p1 = por %p1386_p11, %p1385_p0 }
 0x317   : > { %p1383_p3 = pneg %p1382_p12 }
 0x318   : > { %p1389_p4 = por %p1388_p6, %p1387_p1 }
 0x31a   : > { %p1390_p9 = pnand %p1389_p4, %p1383_p3 }
 0x31c   : > { %1393 = shalt.err (!%p1390_p9)
}
 0x31d   : > { %1116 = dma.vmem_to_hbm [thread:$0]  (%p2018_p10), %s1852_s23, 64, %s1850_s27, %s748_s11  }
 0x31e   : > { %s1892_s26 = scalar_lea.sflag [#allocation13], %s375_s2  ;;  %s1394_s22 = scalar_lea.vmem %s1859_s8, 64 }
 0x31f   : > { %p1395_p8 = scmp.ne.s32.totalorder %s1859_s8, %s1394_s22  ;;  %s1513_s16 = smov [#allocation12]  }
 0x320   : > { %s1398_s12 = sshll.u32 %s1513_s16, 4  ;;  %s1399_s12 = int_to_ptr.vmem [resolvable:$false] %s1398_s12 }
 0x321   : > { %p1396_p13 = pnand %p1395_p8, %p2018_p10  ;;  %s1400_s10 = scalar_lea.vmem %s1399_s12, 128 }
 0x322   : > { %p1401_p2 = scmp.lt.s32.totalorder %s1859_s8, %s1399_s12  ;;  %p1402_p5 = scmp.lt.s32.totalorder %s1400_s10, %s1394_s22 }
 0x323   : > { %p1397_p7 = pneg %p1396_p13 }
 0x324   : > { %p1403_p12 = por %p1402_p5, %p1401_p2 }
 0x326   : > { %p1404_p3 = pnand %p1403_p12, %p1397_p7 }
 0x328   : > { %1407 = shalt.err (!%p1404_p3)
}
 0x329   : > { %s1408_s9 = scalar_lea.hbm %s1857_s13, 64  ;;  %s1412_s27 = scalar_lea.hbm %s1965_s7, 128 }
 0x32a   : > { %p1409_p0 = scmp.ne.s32.totalorder %s1857_s13, %s1408_s9  ;;  %p1413_p6 = scmp.lt.u32.totalorder %s1857_s13, %s1965_s7 }
 0x32b   : > { %p1414_p4 = scmp.lt.u32.totalorder %s1412_s27, %s1408_s9  ;;  %p1416_p8 = scmp.lt.u32.totalorder %s1408_s9, %s1857_s13 }
 0x32c   : > { %p1410_p11 = pnand %p1409_p0, %p2018_p10 }
 0x32d   : > { %p1415_p9 = por %p1414_p4, %p1413_p6 }
 0x32e   : > { %p1411_p1 = pneg %p1410_p11 }
 0x32f   : > { %p1417_p13 = por %p1416_p8, %p1415_p9 }
 0x331   : > { %p1418_p7 = pnand %p1417_p13, %p1411_p1 }
 0x333   : > { %1421 = shalt.err (!%p1418_p7)
}
 0x334   : > { %1117 = dma.vmem_to_hbm [thread:$0]  (%p2018_p10), %s1859_s8, 64, %s1857_s13, %s1892_s26  }
 0x335   : > { %s1422_s29 = scalar_lea.vmem %s1866_s14, 64  ;;  %s1514_s17 = smov [#allocation14]  }
 0x336   : > { %p1423_p2 = scmp.ne.s32.totalorder %s1866_s14, %s1422_s29  ;;  %s1426_s24 = sshll.u32 %s1514_s17, 4  ;;  %s1427_s24 = int_to_ptr.vmem [resolvable:$false] %s1426_s24 }
 0x337   : > { %s1428_s15 = scalar_lea.vmem %s1427_s24, 128  ;;  %p1429_p3 = scmp.lt.s32.totalorder %s1866_s14, %s1427_s24 }
 0x338   : > { %p1424_p5 = pnand %p1423_p2, %p2018_p10  ;;  %p1430_p0 = scmp.lt.s32.totalorder %s1428_s15, %s1422_s29 }
 0x33a   : > { %p1425_p12 = pneg %p1424_p5  ;;  %p1431_p11 = por %p1430_p0, %p1429_p3 }
 0x33c   : > { %p1432_p1 = pnand %p1431_p11, %p1425_p12 }
 0x33e   : > { %1435 = shalt.err (!%p1432_p1)
}
 0x33f   : > { %s1436_s8 = scalar_lea.hbm %s1864_s20, 64  ;;  %s1440_s21 = scalar_lea.hbm %s2017_s18, 128 }
 0x340   : > { %p1437_p6 = scmp.ne.s32.totalorder %s1864_s20, %s1436_s8  ;;  %p1441_p8 = scmp.lt.u32.totalorder %s1864_s20, %s2017_s18 }
 0x341   : > { %p1442_p13 = scmp.lt.u32.totalorder %s1440_s21, %s1436_s8  ;;  %p1444_p2 = scmp.lt.u32.totalorder %s1436_s8, %s1864_s20 }
 0x342   : > { %p1438_p4 = pnand %p1437_p6, %p2018_p10 }
 0x343   : > { %p1443_p7 = por %p1442_p13, %p1441_p8 }
 0x344   : > { %p1439_p9 = pneg %p1438_p4 }
 0x345   : > { %p1445_p5 = por %p1444_p2, %p1443_p7 }
 0x347   : > { %p1446_p12 = pnand %p1445_p5, %p1439_p9 }
 0x349   : > { %1449 = shalt.err (!%p1446_p12)
}
 0x34a   : > { %1118 = dma.vmem_to_hbm [thread:$0]  (%p2018_p10), %s1866_s14, 64, %s1864_s20, %s1892_s26  }
 0x34b PF: > { %s2019_s12 = sld [smem:[#allocation20_spill]]  ;;  %s2020_s10 = sld [smem:[#allocation22_spill]] }
 0x34c   : > { %p2022_p0 = scmp.ge.s32.totalorder %s1500_s30, 2 }
 0x351   : > { %s809_s9 = sand.u32 1, %s2019_s12   ;;  %p2021_p3 = scmp.ne.s32.totalorder %s2020_s10, 0 }
 0x352   : > { %s810_s2 = scalar_lea.sflag [#allocation4], %s809_s9 }
 0x353   : > { %p1140_p11 = pnand %p2022_p0, %p2021_p3 }
 0x355   : > { %1479 = dma.done.wait (!%p1140_p11), %s810_s2, 64  }
 0x356   : > { %1481 = vsyncadd (!%p1140_p11), %s810_s2, 4294967232  ;;  %s2023_s23 = sadd.s32 4294967294, %s1500_s30  }
 0x357   : > { %s818_s27 = sand.u32 1, %s2023_s23  }
 0x358   : > { %s819_s11 = scalar_lea.sflag [#allocation13], %s818_s27 }
 0x359   : > { %1483 = dma.done.wait (!%p1140_p11), %s819_s11, 128  }
 0x35a   : > { %1485 = vsyncadd (!%p1140_p11), %s819_s11, 4294967168  ;;  %s2024_s30 = sld [smem:[#allocation23_spill]]  ;;  %s2025_s25 = sld [smem:[#allocation21_spill]] }
 0x35b   : > { %s2026_s29 = sld [smem:[#allocation24_spill]]  ;;  %s2027_s27 = smov %s1492_s28 }
 0x360   : > { %p29_p10 = scmp.ge.s32.totalorder %s2024_s30, 4   ;;  %s2028_s28 = smov %s2025_s25 }
 0x362   :  { %31 = sbr.rel (!%p29_p10) target bundleno = 14 (0xe), region = 153 }
 0x369   :  { %833 = vsyncpa [#allocation3], 1 }
 0x36a   :  { %835 = vsyncpa [#allocation3 + $0x1], 1 }
 0x36b   :  { %836 = vsyncpa [#allocation6], 1 }
 0x36c   :  { %837 = vsyncpa [#allocation9], 1 }
 0x36d   :  { %839 = vsyncpa [#allocation9 + $0x1], 1 }
 0x36e   :  { %840 = vsyncpa [#allocation4], 1 }
 0x36f   :  { %842 = vsyncpa [#allocation4 + $0x1], 1 }
 0x370   :  { %843 = vsyncpa [#allocation13], 1 }
 0x371   :  { %845 = vsyncpa [#allocation13 + $0x1], 1 }

</bundles_post_ra>
